<compile_context>
chip_gen: v5e
topology: v5e:2x2
jax: 0.10.0
libtpu: 0.0.40
codegen_flags: <defaults>
</compile_context>

<pallas_src>
import functools

import jax
import jax.numpy as jnp
from jax import lax
from jax.experimental import pallas as pl
from jax.experimental.pallas import tpu as pltpu


# ---------------------------------------------------------------------------
# Kernels
# ---------------------------------------------------------------------------

def _spatial_gather_full_hw_kernel(probs_ref, feats_ref, out_ref, *, scale):
    """Fast path: one softmax + one matmul per (b, c_tile) block (full HW)."""
    # probs_ref: (1, K, HW)   feats_ref: (1, c_tile, HW)   out_ref: (1, K, c_tile)
    p = probs_ref[0].astype(jnp.float32)                   # (K, HW)
    s = p if scale == 1.0 else scale * p
    m = jnp.max(s, axis=-1, keepdims=True)                 # (K, 1)
    e = jnp.exp(s - m)                                     # (K, HW)
    inv_l = pl.reciprocal(jnp.sum(e, axis=-1, keepdims=True), approx=False)
    w = e * inv_l                                          # f32 softmax weights

    f = feats_ref[0]                                       # (c_tile, HW)
    # (K, HW) x (c_tile, HW), contracting on HW -> (K, c_tile).  MXU, f32 acc.
    out_ref[0] = lax.dot_general(
        w.astype(f.dtype), f,
        dimension_numbers=(((1,), (1,)), ((), ())),
        preferred_element_type=jnp.float32,
    ).astype(out_ref.dtype)


def _spatial_gather_stream_kernel(probs_ref, feats_ref, out_ref,
                                  m_ref, l_ref, acc_ref, *, scale):
    """Streaming path: online (flash-style) softmax over HW tiles."""
    # probs_ref: (1, K, T)   feats_ref: (1, c_tile, T)   out_ref: (1, K, c_tile)
    # scratch:   m_ref (K,1) l_ref (K,1) acc_ref (K, c_tile)   (all f32)
    t = pl.program_id(2)

    @pl.when(t == 0)
    def _init():
        m_ref[...] = jnp.full_like(m_ref, -jnp.inf)
        l_ref[...] = jnp.zeros_like(l_ref)
        acc_ref[...] = jnp.zeros_like(acc_ref)

    p = probs_ref[0].astype(jnp.float32)                   # (K, T)
    f = feats_ref[0]                                       # (c_tile, T)
    s = p if scale == 1.0 else scale * p

    m_prev = m_ref[...]                                    # (K, 1)
    m_new = jnp.maximum(m_prev, jnp.max(s, axis=-1, keepdims=True))
    e = jnp.exp(s - m_new)                                 # (K, T)
    corr = jnp.exp(m_prev - m_new)                         # (K, 1)

    l_ref[...] = corr * l_ref[...] + jnp.sum(e, axis=-1, keepdims=True)
    m_ref[...] = m_new

    part = lax.dot_general(
        e.astype(f.dtype), f,
        dimension_numbers=(((1,), (1,)), ((), ())),
        preferred_element_type=jnp.float32,
    )
    acc_ref[...] = corr * acc_ref[...] + part

    @pl.when(t == pl.num_programs(2) - 1)
    def _finalize():
        inv_l = pl.reciprocal(l_ref[...], approx=False)
        out_ref[0] = (acc_ref[...] * inv_l).astype(out_ref.dtype)


# ---------------------------------------------------------------------------
# Tiling / VMEM heuristics (chip-generation aware)
# ---------------------------------------------------------------------------

def _round_up(x, m):
    return (x + m - 1) // m * m


def _vmem_capacity_bytes():
    try:
        return int(pltpu.get_tpu_info().vmem_capacity_bytes)
    except Exception:
        return 64 * 1024 * 1024          # conservative (v7x-sized) fallback


def _num_tensorcores():
    """Best-effort TensorCore-per-chip count (2 on v7x, 1 on v5e/v6e)."""
    try:
        info = pltpu.get_tpu_info()
    except Exception:
        return 1
    for attr in ("num_tensorcores", "tensorcores_per_chip",
                 "num_tensor_cores", "cores_per_chip"):
        v = getattr(info, attr, None)
        if isinstance(v, int) and v > 0:
            return v
    # Heuristic fallback: v7x exposes 64 MiB VMEM per TC and has 2 TCs;
    # v5e/v6e expose 128 MiB and have 1 TC.
    vmem = getattr(info, "vmem_capacity_bytes", 128 * 1024 * 1024)
    return 2 if vmem <= 64 * 1024 * 1024 else 1


def _feats_budget_bytes(vmem):
    """Per-buffer budget for the streamed feats block.

    ~1/8 of VMEM: 16 MiB on 128-MiB chips (v5e/v6e), 8 MiB on 64-MiB v7x.
    """
    return max(2 << 20, min(16 << 20, vmem // 8))


def _c_tile_candidates(C):
    """Legal c_tile values: multiples of 128 dividing C, plus C itself (desc)."""
    cands = {C}
    for t in range(128, C, 128):
        if C % t == 0:
            cands.add(t)
    return sorted(cands, reverse=True)


def _choose_tiling(C, HW, itemsize, B):
    """Return (c_tile, hw_tile).  hw_tile >= HW means 'fast path, full HW'."""
    vmem = _vmem_capacity_bytes()
    budget = _feats_budget_bytes(vmem)
    cands = _c_tile_candidates(C)

    # Split C for megacore only when the batch alone cannot feed 2+ TCs AND the
    # chip actually has 2+ TensorCores (v7x).  On 1-TC chips it only costs.
    if B == 1 and _num_tensorcores() >= 2:
        split = [c for c in cands if c <= C // 2]
        if split:
            cands = split

    # Fast path: largest c_tile whose full-HW (fully contiguous) block fits.
    for ct in cands:
        if ct * HW * itemsize <= budget:
            return ct, HW

    # Streaming path: tile HW, but keep strided DMA rows >= ~8 KiB.
    floor = 2048 if itemsize >= 4 else 4096
    c_t = cands[-1]
    for ct in cands:
        if ct * floor * itemsize <= budget:
            c_t = ct
            break
    hw_tile = max(floor, (budget // max(1, c_t * itemsize)) // 128 * 128)
    hw_tile = min(hw_tile, _round_up(HW, 128))
    return c_t, hw_tile


def _derive_vmem_limit(K, c_tile, hw_tile, p_item, f_item, o_item, streaming):
    """vmem_limit_bytes from the real footprint (double-buffered blocks +
    f32 intermediates + scratch), clamped to the chip's physical VMEM."""
    vmem = _vmem_capacity_bytes()
    K8 = _round_up(max(K, 8), 8)
    hw = _round_up(hw_tile, 128)
    ct8 = _round_up(max(c_tile, 8), 8)
    ct128 = _round_up(c_tile, 128)

    total = 0
    total += 2 * K8 * hw * p_item            # probs blocks (double-buffered)
    total += 2 * ct8 * hw * f_item           # feats blocks (double-buffered)
    total += 2 * K8 * ct128 * o_item         # output blocks
    total += 4 * K8 * hw * 4                 # f32 intermediates (s, e, temps)
    if streaming:
        total += K8 * ct128 * 4 + 2 * K8 * 128 * 4   # acc + m, l scratch

    limit = int(total * 1.25) + (8 << 20)
    limit = max(32 << 20, min(limit, vmem - (8 << 20)))
    return limit


# ---------------------------------------------------------------------------
# Wrapper
# ---------------------------------------------------------------------------

def spatial_gather(feats, probs, scale=1.0, *, c_tile=None, hw_tile=None):
    """feats: (B, C, H, W), probs: (B, K, H, W) -> (B, C, K, 1)."""
    B, C, H, W = feats.shape
    Bp, K, Hp, Wp = probs.shape
    assert (B, H, W) == (Bp, Hp, Wp)
    HW = H * W

    f_item = jnp.dtype(feats.dtype).itemsize
    p_item = jnp.dtype(probs.dtype).itemsize
    out_dtype = feats.dtype

    auto_ct, auto_hw = _choose_tiling(C, HW, f_item, B)
    if c_tile is None:
        c_tile = auto_ct
    if hw_tile is None:
        hw_tile = auto_hw
    assert C % c_tile == 0
    n_c = C // c_tile

    # Free reshapes only — feats is never transposed in HBM.
    probs_r = probs.reshape(B, K, HW)        # (B, K, HW)
    feats_r = feats.reshape(B, C, HW)        # (B, C, HW), natural layout

    # scale must be a static Python constant (enables the scale==1.0 fast path).
    scale = float(scale)

    if hw_tile >= HW:
        # ---- Fast path: contiguous full-HW feats blocks, grid = (B, n_c). ----
        kernel = functools.partial(_spatial_gather_full_hw_kernel, scale=scale)
        vmem_limit = _derive_vmem_limit(K, c_tile, HW, p_item, f_item,
                                        jnp.dtype(out_dtype).itemsize,
                                        streaming=False)
        ctx = pl.pallas_call(
            kernel,
            out_shape=jax.ShapeDtypeStruct((B, K, C), out_dtype),
            grid_spec=pltpu.PrefetchScalarGridSpec(
                num_scalar_prefetch=0,
                grid=(B, n_c),
                in_specs=[
                    # probs index_map is independent of c: the block index stays
                    # the same across consecutive c steps, so Pallas skips the
                    # re-DMA of probs while C tiles stream.
                    pl.BlockSpec((1, K, HW), lambda b, c: (b, 0, 0)),
                    pl.BlockSpec((1, c_tile, HW), lambda b, c: (b, c, 0)),
                ],
                out_specs=pl.BlockSpec((1, K, c_tile), lambda b, c: (b, 0, c)),
            ),
            compiler_params=pltpu.CompilerParams(
                dimension_semantics=("parallel", "parallel"),
                vmem_limit_bytes=vmem_limit,
            ),
        )(probs_r, feats_r)                                   # (B, K, C)
    else:
        # ---- Streaming path: HW tiled, online softmax, grid = (B, n_c, n_t). --
        assert hw_tile % 128 == 0
        HW_pad = _round_up(HW, hw_tile)
        if HW_pad != HW:
            pad = HW_pad - HW
            # exp(scale * -1e30 - m) == 0, so padded positions never contribute.
            probs_r = jnp.pad(probs_r, ((0, 0), (0, 0), (0, pad)),
                              constant_values=-1e30)
            feats_r = jnp.pad(feats_r, ((0, 0), (0, 0), (0, pad)))
        n_t = HW_pad // hw_tile

        kernel = functools.partial(_spatial_gather_stream_kernel, scale=scale)
        vmem_limit = _derive_vmem_limit(K, c_tile, hw_tile, p_item, f_item,
                                        jnp.dtype(out_dtype).itemsize,
                                        streaming=True)
        ctx = pl.pallas_call(
            kernel,
            out_shape=jax.ShapeDtypeStruct((B, K, C), out_dtype),
            grid_spec=pltpu.PrefetchScalarGridSpec(
                num_scalar_prefetch=0,
                grid=(B, n_c, n_t),
                in_specs=[
                    pl.BlockSpec((1, K, hw_tile), lambda b, c, t: (b, 0, t)),
                    pl.BlockSpec((1, c_tile, hw_tile), lambda b, c, t: (b, c, t)),
                ],
                out_specs=pl.BlockSpec((1, K, c_tile), lambda b, c, t: (b, 0, c)),
                scratch_shapes=[
                    pltpu.VMEM((K, 1), jnp.float32),        # running max m
                    pltpu.VMEM((K, 1), jnp.float32),        # running sum l
                    pltpu.VMEM((K, c_tile), jnp.float32),   # unnormalized context
                ],
            ),
            compiler_params=pltpu.CompilerParams(
                dimension_semantics=("parallel", "parallel", "arbitrary"),
                vmem_limit_bytes=vmem_limit,
            ),
        )(probs_r, feats_r)                                   # (B, K, C)

    # Tiny output permute (K*C elements per batch) + unsqueeze -> (B, C, K, 1).
    return ctx.transpose(0, 2, 1)[..., None]


# ---------------------------------------------------------------------------
# Reference + self-test
# ---------------------------------------------------------------------------

def _reference(feats, probs, scale=1.0):
    B, K, H, W = probs.shape
    C = feats.shape[1]
    p = probs.reshape(B, K, -1)
    f = feats.reshape(B, C, -1).transpose(0, 2, 1)
    p = jax.nn.softmax(scale * p, axis=2)
    out = jnp.einsum("bks,bsc->bkc", p, f)
    return out.transpose(0, 2, 1)[..., None]


if __name__ == "__main__":
    key = jax.random.PRNGKey(0)
    kf, kp, kf2, kp2 = jax.random.split(key, 4)

    B, C, K, H, W = 2, 16, 4, 16, 16   # small shapes consistent with the module
    feats = jax.random.normal(kf, (B, C, H, W), dtype=jnp.float32)
    probs = jax.random.normal(kp, (B, K, H, W), dtype=jnp.float32)

    # 1) Default tiling -> fast path (contiguous full-HW feats blocks).
    out = jax.block_until_ready(spatial_gather(feats, probs, scale=1.0))
    ref = _reference(feats, probs, scale=1.0)
    assert out.shape == (B, C, K, 1), out.shape
    assert jnp.allclose(out, ref, atol=1e-5, rtol=1e-5), (
        float(jnp.max(jnp.abs(out - ref))))

    # 2) Forced HW tiling -> streaming path (online softmax), scale != 1.
    out2 = jax.block_until_ready(spatial_gather(feats, probs, scale=2.0,
                                                hw_tile=128))
    ref2 = _reference(feats, probs, scale=2.0)
    assert jnp.allclose(out2, ref2, atol=1e-5, rtol=1e-5), (
        float(jnp.max(jnp.abs(out2 - ref2))))

    # 3) HW not a multiple of the tile -> wrapper pads (probs -1e30, feats 0).
    H3 = W3 = 15   # HW = 225
    feats3 = jax.random.normal(kf2, (B, C, H3, W3), dtype=jnp.float32)
    probs3 = jax.random.normal(kp2, (B, K, H3, W3), dtype=jnp.float32)
    out3 = jax.block_until_ready(spatial_gather(feats3, probs3, scale=1.0,
                                                hw_tile=128))
    ref3 = _reference(feats3, probs3, scale=1.0)
    assert out3.shape == (B, C, K, 1), out3.shape
    assert jnp.allclose(out3, ref3, atol=1e-5, rtol=1e-5), (
        float(jnp.max(jnp.abs(out3 - ref3))))

    print("KERNEL_OK")
</pallas_src>

<mosaic_0001>
module attributes {stable_mosaic.version = 11 : i64} {
  func.func @_spatial_gather_full_hw_kernel(%arg0: i32, %arg1: i32, %arg2: memref<1x4x256xf32, #tpu.memory_space<vmem>>, %arg3: memref<1x16x256xf32, #tpu.memory_space<vmem>>, %arg4: memref<1x4x16xf32, #tpu.memory_space<vmem>>) attributes {dimension_semantics = [#tpu.dimension_semantics<parallel>, #tpu.dimension_semantics<parallel>], iteration_bounds = array<i64: 2, 1>, scalar_prefetch = 0 : i64, scratch_operands = 0 : i64, tpu.core_type = #tpu.core_type<tc>, window_params = [{transform_indices = @transform_0, window_bounds = array<i64: 1, 4, 256>}, {transform_indices = @transform_1, window_bounds = array<i64: 1, 16, 256>}, {transform_indices = @transform_2, window_bounds = array<i64: 1, 4, 16>}]} {
    %c0 = arith.constant 0 : index
    %c0_0 = arith.constant 0 : index
    %c0_1 = arith.constant 0 : index
    %0 = vector.load %arg2[%c0, %c0_0, %c0_1] : memref<1x4x256xf32, #tpu.memory_space<vmem>>, vector<1x4x256xf32>
    %1 = vector.shape_cast %0 : vector<1x4x256xf32> to vector<4x256xf32>
    %cst = arith.constant dense<0xFF800000> : vector<4xf32>
    %2 = vector.multi_reduction <maximumf>, %1, %cst [1] : vector<4x256xf32> to vector<4xf32>
    %3 = vector.shape_cast %2 : vector<4xf32> to vector<4x1xf32>
    %4 = vector.broadcast %3 : vector<4x1xf32> to vector<4x256xf32>
    %5 = arith.subf %1, %4 : vector<4x256xf32>
    %6 = math.exp %5 : vector<4x256xf32>
    %cst_2 = arith.constant dense<0.000000e+00> : vector<4xf32>
    %7 = vector.multi_reduction <add>, %6, %cst_2 [1] : vector<4x256xf32> to vector<4xf32>
    %8 = vector.shape_cast %7 : vector<4xf32> to vector<4x1xf32>
    %9 = tpu.reciprocal %8 : vector<4x1xf32> -> vector<4x1xf32>
    %10 = vector.broadcast %9 : vector<4x1xf32> to vector<4x256xf32>
    %11 = arith.mulf %6, %10 : vector<4x256xf32>
    %c0_3 = arith.constant 0 : index
    %c0_4 = arith.constant 0 : index
    %c0_5 = arith.constant 0 : index
    %12 = vector.load %arg3[%c0_3, %c0_4, %c0_5] : memref<1x16x256xf32, #tpu.memory_space<vmem>>, vector<1x16x256xf32>
    %13 = vector.shape_cast %12 : vector<1x16x256xf32> to vector<16x256xf32>
    %cst_6 = arith.constant dense<0.000000e+00> : vector<4x16xf32>
    %14 = tpu.matmul %11, %13, %cst_6 {dimension_numbers = #tpu.dot_dimension_numbers<[1], [1], [0], [0], [0, 0, 1, 0], [], []>} : vector<4x256xf32>, vector<16x256xf32>, vector<4x16xf32> -> vector<4x16xf32>
    %c0_7 = arith.constant 0 : index
    %c0_8 = arith.constant 0 : index
    %c0_9 = arith.constant 0 : index
    %15 = vector.load %arg4[%c0_7, %c0_8, %c0_9] : memref<1x4x16xf32, #tpu.memory_space<vmem>>, vector<1x4x16xf32>
    %16 = vector.shape_cast %15 : vector<1x4x16xf32> to vector<4x16xf32>
    %17 = vector.shape_cast %14 : vector<4x16xf32> to vector<1x4x16xf32>
    tpu.vector_store %arg4[%c0_7, %c0_8, %c0_9], %17 {strides = array<i32>} : memref<1x4x16xf32, #tpu.memory_space<vmem>>, vector<1x4x16xf32>,
    return
  }
  func.func @transform_0(%arg0: i32, %arg1: i32) -> (i32, i32, i32) {
    %c0_i32 = arith.constant 0 : i32
    %c0_i32_0 = arith.constant 0 : i32
    %c0_i32_1 = arith.constant 0 : i32
    return %arg0, %c0_i32, %c0_i32_0 : i32, i32, i32
  }
  func.func @transform_1(%arg0: i32, %arg1: i32) -> (i32, i32, i32) {
    %c0_i32 = arith.constant 0 : i32
    %c0_i32_0 = arith.constant 0 : i32
    return %arg0, %arg1, %c0_i32 : i32, i32, i32
  }
  func.func @transform_2(%arg0: i32, %arg1: i32) -> (i32, i32, i32) {
    %c0_i32 = arith.constant 0 : i32
    %c0_i32_0 = arith.constant 0 : i32
    return %arg0, %c0_i32, %arg1 : i32, i32, i32
  }
}

</mosaic_0001>

<bundles_post_ra>
// kernel: tpu_custom_call.1
= control target key start
LH: loop header
LB: loop body
LE: loop exit
PB: predicated region body
PF: predicated region fallthrough
CT: control target
= control target key end

     0   :  { %7 = vsyncpa [#allocation3], 0  ;;  %s867_s0 = inlined_call_operand.hbm [shape: f32[2,4,256], index: 0, kind: input, shape index: {}]   ;;  %s868_s1 = inlined_call_operand.hbm [shape: f32[2,16,256], index: 1, kind: input, shape index: {}]   ;;  %s869_s2 = inlined_call_operand.hbm [shape: f32[2,4,16], index: 2, kind: output, shape index: {}]  }
   0x1   :  { %9 = vsyncpa [#allocation3 + $0x1], 0 }
   0x2   :  { %10 = vsyncpa [#allocation6], 0 }
   0x3   :  { %12 = vsyncpa [#allocation6 + $0x1], 0 }
   0x4   :  { %13 = vsyncpa [#allocation4], 0 }
   0x5   :  { %15 = vsyncpa [#allocation4 + $0x1], 0  ;;  %s712_s9 = smov 0   ;;  %s714_s10 = smov 0  }
   0x6   :  { %s716_s11 = smov 0   ;;  %s718_s12 = smov 0  }
   0x7   :  { %s720_s13 = smov 0   ;;  %s722_s14 = smov 0  }
   0x8 LB: > { %s452_s15 = sadd.s32 4294967295, %s692_s14   ;;  %s453_s16 = sadd.s32 4294967294, %s692_s14   ;;  %s692_s14 = sphi %s722_s14, %s21_s14   ;;  %s688_s13 = sphi %s720_s13, %s879_s13   ;;  %s684_s12 = sphi %s718_s12, %s878_s12   ;;  %s680_s11 = sphi %s716_s11, %s877_s11   ;;  %s676_s10 = sphi %s714_s10, %s876_s10   ;;  %s672_s9 = sphi %s712_s9, %s875_s9  }
   0x9   : > { %s33_s17 = sadd.s32 1, %s688_s13  ;;  %s40_s18 = sadd.s32 1, %s680_s11 }
   0xa   : > { %p35_p0 = scmp.ge.s32.totalorder %s33_s17, 2  ;;  %p47_p1 = scmp.ne.s32.totalorder %s680_s11, %s676_s10 }
   0xb   : > { %p48_p2 = scmp.eq.s32.totalorder %s692_s14, 0  ;;  %p53_p3 = scmp.ne.s32.totalorder %s676_s10, %s672_s9 }
   0xc   : > { %s881_s17 = smov (%p35_p0, %s33_s17), 0  ;;  %p54_p5 = scmp.eq.s32.totalorder %s452_s15, 0 }
   0xd   : > { %p753_p4 = por %p48_p2, %p47_p1  ;;  %s37_s20 = ssub.s32 %s688_s13, %s881_s17 }
   0xe   : > { %p107_p6 = scmp.eq.s32.totalorder %s452_s15, 1  ;;  %p38_p7 = scmp.eq.s32.totalorder %s37_s20, 0 }
   0xf   : > { %p759_p8 = por %p54_p5, %p53_p3  ;;  %p113_p10 = scmp.eq.s32.totalorder %s453_s16, 1 }
  0x10   : > { %p763_p9 = por %p107_p6, %p47_p1  ;;  %p455_p12 = scmp.ge.s32.totalorder %s692_s14, 2 }
  0x11   : > { %s768_s23 = scalar_select %p38_p7, %s680_s11, %s40_s18  }
  0x12   : > { %p770_p11 = por %p113_p10, %p53_p3  ;;  %p489_p13 = scmp.lt.s32.totalorder %s692_s14, 2 }
  0x13   : > { %s777_s25 = sand.u32 1, %s680_s11   ;;  %s470_s27 = sshll.u32 %s688_s13, 3 }
  0x14   : > { %s456_s26 = sshll.u32 %s777_s25, 3  ;;  %s142_s30 = scalar_lea.hbm %s867_s0, %s470_s27 }
  0x15   : > { %s137_s3 = scalar_lea.vmem [#allocation2], %s456_s26  ;;  %s144_s5 = sshll.u32 %s142_s30, 4  ;;  %s145_s5 = int_to_ptr.hbm [resolvable:$true] %s144_s5 }
  0x16   : > { %s146_s4 = sshll.u32 %s137_s3, 4  ;;  %p786_p0 = pnand %p489_p13, %p753_p4  ;;  %s147_s4 = int_to_ptr.vmem [resolvable:$true] %s146_s4 }
  0x17   : > { %p462_p1 = scmp.ge.s32.totalorder %s692_s14, 1  ;;  %p176_p2 = scmp.lt.s32.totalorder %s692_s14, 3 }
  0x18   : > { %s134_s7 = scalar_lea.sflag [#allocation3], %s777_s25  ;;  %s459_s8 = sshll.u32 %s777_s25, 5 }
  0x19   : > { %481 = dma.hbm_to_vmem [thread:$0]  (!%p786_p0), %s145_s5, 128, %s147_s4, %s134_s7  }
  0x1a   : > { %p177_p3 = pnand %p462_p1, %p176_p2  ;;  %s471_s15 = sshll.u32 %s688_s13, 5 }
  0x1b   : > { %s165_s20 = scalar_lea.hbm %s868_s1, %s471_s15  ;;  %s157_s26 = scalar_lea.vmem [#allocation5], %s459_s8 }
  0x1c   : > { %s168_s19 = sshll.u32 %s157_s26, 4  ;;  %s166_s27 = sshll.u32 %s165_s20, 4  ;;  %s169_s19 = int_to_ptr.vmem [resolvable:$true] %s168_s19  ;;  %s167_s27 = int_to_ptr.hbm [resolvable:$true] %s166_s27 }
  0x1d   : > { %s154_s28 = scalar_lea.sflag [#allocation6], %s777_s25  ;;  %s694_s29 = smov 256  }
  0x1e   : > { %s695_s30 = smov 16   ;;  %180 = sbr.rel (%p177_p3) target bundleno = 467 (0x1d3), region = 28 }
  0x1f   : > { %484 = dma.hbm_to_vmem [thread:$0]  (!%p786_p0), %s167_s27, 512, %s169_s19, %s154_s28, %s694_s29, %s694_s29, %s695_s30  }
  0x20   : > { %s804_s3 = sand.u32 (!%p177_p3), 1, %s676_s10  }
  0x21   : > { %s463_s4 = sshll.u32 (!%p177_p3), %s804_s3, 3  ;;  %s183_s5 = scalar_lea.sflag (!%p177_p3), [#allocation3], %s804_s3 }
  0x22   : > { %s186_s7 = scalar_lea.vmem (!%p177_p3), [#allocation2], %s463_s4 }
  0x23   : > { %659 = dma.done.wait (%p759_p8), %s183_s5, 128  }
  0x24   : > { %661 = vsyncadd (%p759_p8), %s183_s5, 4294967168  ;;  %s464_s25 = sshll.u32 %s804_s3, 5  ;;  %s193_s6 = scalar_lea.sflag [#allocation6], %s804_s3 }
  0x25   : > { %s814_s8 = scalar_lea.vmem [#allocation5], %s464_s25 }
  0x26   : > { %663 = dma.done.wait (%p759_p8), %s193_s6, 512  }
  0x27   : > { %665 = vsyncadd (%p759_p8), %s193_s6, 4294966784  ;;  %v224_v0 = vld [vmem:[%s186_s7] sm:$0xff]  ;;  %vm231_vm0 = vcmask 1043456   ;;  %v696_v6 = vmov 839922192   ;;  %v278_v21 = vld [vmem:[%s814_s8] sm:$0xff] }
  0x28   : > { %226 = vst [vmem:[#allocation1] ss:$2 sm:$0xff] %v224_v0  ;;  %v239_v7 = vunpack.c.l.s4 %v696_v6  ;;  %v280_v19 = vld [vmem:[%s814_s8 + $0x10] sm:$0xff]  ;;  %v281_v20 = vld [vmem:[%s814_s8 + $0x18] sm:$0xff]  ;;  %v279_v22 = vld [vmem:[%s814_s8 + $0x8] sm:$0xff]  ;;  %s465_s21 = sshll.u32 %s804_s3, 2 }
  0x29   : > { %302 = vmatpush.xpose.msra.mxu0 %v280_v19  ;;  %322 = vmatpush.xpose.msra.mxu1 %v281_v20  ;;  %s467_s15 = sshll.u32 %s684_s12, 2  ;;  %s222_s26 = scalar_lea.vmem [#allocation7], %s465_s21  ;;  %vm328_vm5 = vcmask 125952  }
  0x2a   : > { %v240_v8 = vunpack.c.0.s8 %v239_v7  ;;  %s342_s20 = scalar_lea.hbm %s869_s2, %s467_s15  ;;  %s344_s19 = sshll.u32 %s222_s26, 4  ;;  %s345_s19 = int_to_ptr.vmem [resolvable:$true] %s344_s19 }
  0x2b   : > { %s346_s27 = sshll.u32 %s342_s20, 4  ;;  %s331_s28 = scalar_lea.sflag [#allocation4], %s804_s3  ;;  %s347_s27 = int_to_ptr.hbm [resolvable:$true] %s346_s27 }
  0x2c   : > { %s620_s29 = sshra.s32 %s347_s27, 4  ;;  %s626_s5 = scalar_lea.hbm %s869_s2, 8  ;;  %s621_s29 = int_to_ptr.hbm [resolvable:$true] %s620_s29 }
  0x2d   : > { %303 = vmatpush.xpose.msra.mxu0 %v278_v21  ;;  %323 = vmatpush.xpose.msra.mxu1 %v279_v22  ;;  %s622_s30 = scalar_lea.hbm %s621_s29, 4  ;;  %p627_p7 = scmp.lt.s32.totalorder %s621_s29, %s869_s2 }
  0x2e   : > { %p623_p4 = scmp.ne.s32.totalorder %s621_s29, %s622_s30  ;;  %p628_p8 = scmp.lt.s32.totalorder %s626_s5, %s622_s30 }
  0x2f   : > { %v227_v1 = vld.sshfl [vmem:[#allocation1] sm:$0xff pattern:$0x75316420]  ;;  %v228_v2 = vld.sshfl [vmem:[#allocation1 + $0x8] sm:$0xff pattern:$0x75316420] }
  0x30   : > { %v232_v3 = vsel %vm231_vm0, %v227_v1, -inf  ;;  %v233_v4 = vsel %vm231_vm0, %v228_v2, -inf  ;;  %p624_p5 = pnand %p623_p4, %p763_p9  ;;  %p629_p10 = por %p628_p8, %p627_p7 }
  0x31   : > { %v234_v5 = vmax.f32 %v232_v3, %v233_v4 }
  0x32   : > { %p625_p6 = pneg %p624_p5 }
  0x33   : > { %235 = vmax.xlane.f32.xlu0 %v234_v5 }
  0x34   : > { %p630_p13 = pnand %p629_p10, %p625_p6 }
  0xa6   : > { %v236_v9 = vpop.xlane.xlu0 %235 }
  0xa7   : > { %v241_v10 = vperm.slane %v236_v9, %v240_v8 }
  0xa9   : > { %v243_v11 = vsub.f32 %v224_v0, %v241_v10 }
  0xab   : > { %v244_v12 = vmul.f32 1.442695, %v243_v11 }
  0xad   : > { %542 = vpow2.f32 %v244_v12 }
  0xb3   : > { %v543_v13 = vpop.eup %542 }
  0xb4   : > { %247 = vst [vmem:[#allocation1] ss:$2 sm:$0xff] %v543_v13 }
  0xbb   : > { %v248_v14 = vld.sshfl [vmem:[#allocation1] sm:$0xff pattern:$0x75316420]  ;;  %v249_v15 = vld.sshfl [vmem:[#allocation1 + $0x8] sm:$0xff pattern:$0x75316420] }
  0xbc   : > { %v252_v16 = vsel %vm231_vm0, %v248_v14, 0.0  ;;  %v253_v17 = vsel %vm231_vm0, %v249_v15, 0.0 }
  0xbd   : > { %v254_v18 = vadd.f32 %v253_v17, %v252_v16 }
  0xbf   : > { %255 = vadd.xlane.f32.xlu0 %v254_v18 }
 0x132   : > { %v256_v23 = vpop.xlane.xlu0 %255 }
 0x133   : > { %544 = vrcp.f32 %v256_v23  ;;  %v268_v27 = vand.u32 2147483648, %v256_v23  ;;  %v266_v29 = vand.u32 2147483647, %v256_v23  ;;  %vm262_vm2 = vweird.f32 %v256_v23 }
 0x135   : > { %v269_v31 = vor.u32 1.1754944e-38, %v268_v27  ;;  %vm267_vm4 = vcmp.eq.f32.partialorder %v266_v29, 8.507059e+37 }
 0x139   : > { %v545_v24 = vpop.eup %544 }
 0x13a   : > { %v258_v25 = vmul.f32 %v545_v24, %v256_v23  ;;  %vm263_vm1 = vweird.f32 %v545_v24 }
 0x13b   : > { %vm264_vm3 = vmor %vm262_vm2, %vm263_vm1 }
 0x13c   : > { %v259_v26 = vsub.f32 1.0, %v258_v25 }
 0x13e   : > { %v260_v28 = vmul.f32 %v545_v24, %v259_v26 }
 0x140   : > { %v261_v30 = vadd.f32 %v545_v24, %v260_v28 }
 0x142   : > { %v265_v32 = vsel %vm264_vm3, %v545_v24, %v261_v30 }
 0x143   : > { %v270_v33 = vsel %vm267_vm4, %v269_v31, %v265_v32 }
 0x144   : > { %v275_v34 = vperm.slane %v270_v33, %v240_v8 }
 0x146   : > { %v277_v35 = vmul.f32 %v543_v13, %v275_v34 }
 0x148   : > { %283 = vst [vmem:[#allocation1] ss:$2 sm:$0xff] %v277_v35 }
 0x14f   : > { %v284_v36 = vld.sshfl [vmem:[#allocation1] sm:$0xff pattern:$0x75316420]  ;;  %v285_v37 = vld.sshfl [vmem:[#allocation1 + $0x8] sm:$0xff pattern:$0x75316420] }
 0x150   : > { %304 = vmatmul.f32.vlgmr.msra.gmra.mxu0 %v284_v36  ;;  %324 = vmatmul.f32.vlgmr.msra.gmra.mxu1 %v285_v37 }
 0x1cd   : > { %v305_v38 = vpop.f32.mrf.mxu0  ;;  %v325_v39 = vpop.f32.mrf.mxu1 }
 0x1ce   : > { %v326_v40 = vadd.f32 %v325_v39, %v305_v38 }
 0x1d0   : > { %329 = vst.msk [vmem:[%s222_s26] sm:$0xf] %vm328_vm5, %v326_v40 }
 0x1d1   : > { %633 = shalt.err (!%p630_p13)
}
 0x1d2   : > { %476 = dma.vmem_to_hbm [thread:$0]  (%p763_p9), %s345_s19, 64, %s347_s27, %s331_s28  }
 0x1d3 PF: > { %s358_s3 = sand.u32 1, %s672_s9   ;;  %p486_p0 = pnand %p455_p12, %p770_p11 }
 0x1d4   : > { %s359_s6 = scalar_lea.sflag [#allocation4], %s358_s3 }
 0x1d5   : > { %p487_p1 = pneg %p486_p0 }
 0x1d7   : > { %667 = dma.done.wait (%p487_p1), %s359_s6, 64  }
 0x1d8   : > { %669 = vsyncadd (%p487_p1), %s359_s6, 4294967232  ;;  %s21_s14 = sadd.s32 1, %s692_s14   ;;  %s875_s9 = smov %s676_s10 }
 0x1d9   : > { %p18_p2 = scmp.ge.s32.totalorder %s21_s14, 4   ;;  %s876_s10 = smov %s680_s11 }
 0x1da   : > { %s877_s11 = smov %s768_s23  ;;  %s878_s12 = smov %s688_s13 }
 0x1db   : > { %s879_s13 = smov %s881_s17  ;;  %20 = sbr.rel (!%p18_p2) target bundleno = 8 (0x8), region = 86 }
 0x1e0   :  { %365 = vsyncpa [#allocation3], 1 }
 0x1e1   :  { %367 = vsyncpa [#allocation3 + $0x1], 1 }
 0x1e2   :  { %368 = vsyncpa [#allocation6], 1 }
 0x1e3   :  { %370 = vsyncpa [#allocation6 + $0x1], 1 }
 0x1e4   :  { %371 = vsyncpa [#allocation4], 1 }
 0x1e5   :  { %373 = vsyncpa [#allocation4 + $0x1], 1 }

</bundles_post_ra>
